<compile_context>
chip_gen: v7x
topology: tpu7x:2x2x1
jax: 0.10.0
libtpu: 0.0.40
codegen_flags: <defaults>
</compile_context>

<pallas_src>
import math
import functools

import jax
import jax.numpy as jnp
from jax.experimental import pallas as pl
from jax.experimental.pallas import tpu as pltpu


def masked_sab_kernel(x_ref, maskr_ref, wqkv_ref, bqkv_ref, wo_ref, bo_ref,
                      o_ref, q_scr, kv_scr, mcol_scr, oacc,
                      *, num_heads, dim_V, dim_in, tq):
    qi = pl.program_id(1)

    # ---- once per batch: fused Q|K|V projection into persistent VMEM scratch.
    @pl.when(qi == 0)
    def _():
        xa = x_ref[0]                                         # (N, dim_in+1) bf16
        m_col = xa[:, dim_in:dim_in + 1].astype(jnp.float32)  # (N, 1) mask column
        mcol_scr[...] = m_col
        qkv = (jnp.dot(xa, wqkv_ref[...],
                       preferred_element_type=jnp.float32)
               + bqkv_ref[...]) * m_col                        # (N, 3*dim_V) f32
        q_scr[...] = qkv[:, :dim_V]                            # Q kept f32 (residual)
        kv_scr[...] = qkv[:, dim_V:].astype(jnp.bfloat16)      # K|V bf16

    # ---- per query tile ----
    row0 = pl.multiple_of(qi * tq, tq)
    q_f32 = q_scr[pl.ds(row0, tq), :]                          # (Tq, dim_V) f32
    m_q = mcol_scr[pl.ds(row0, tq), :]                         # (Tq, 1)  query mask
    m_k = maskr_ref[0]                                         # (1, N)   key mask
    mm = m_q * m_k                                             # (Tq, N)  hoisted

    scale = 1.0 / math.sqrt(dim_V)                             # sqrt(dim_V), per module
    q_bf = (q_f32 * scale).astype(jnp.bfloat16)                # fold scale into Q

    hd = dim_V // num_heads
    for h in range(num_heads):                                 # static unroll, small H
        lo = h * hd
        qh = q_bf[:, lo:lo + hd]                               # (Tq, hd) bf16
        kh = kv_scr[:, lo:lo + hd]                             # (N, hd)  bf16
        vh = kv_scr[:, dim_V + lo:dim_V + lo + hd]             # (N, hd)  bf16

        s = jnp.einsum('qd,kd->qk', qh, kh,
                       preferred_element_type=jnp.float32)     # (Tq, N) f32

        # masked_softmax as in the PyTorch module (max over ALL keys):
        #   exp((s-max)*mm)*mm == exp(s-max)*mm exactly since s-max <= 0.
        mx = jnp.max(s, axis=1, keepdims=True)                 # (Tq, 1)
        num = jnp.exp(s - mx) * mm
        dem = jnp.sum(num, axis=1, keepdims=True)
        inv = jnp.where(dem > 0.0,
                        pl.reciprocal(dem + 1e-16, approx=True),
                        0.0)                                   # fully-masked rows -> 0
        a = num * inv

        pv = jnp.dot(a.astype(jnp.bfloat16), vh,
                     preferred_element_type=jnp.float32)       # (Tq, hd)
        oacc[:, lo:lo + hd] = q_f32[:, lo:lo + hd] + pv        # head h on feature dim

    o = oacc[...]                                              # (Tq, dim_V) f32
    proj = (jnp.dot(o.astype(jnp.bfloat16), wo_ref[...],
                    preferred_element_type=jnp.float32) + bo_ref[...]) * m_q
    o_ref[0] = (o + jnp.maximum(proj, 0.0)).astype(o_ref.dtype)


def _padded_vmem_bytes(shape, dtype):
    """Rough VMEM footprint of one buffer, padded to native (sublane, 128) tiles."""
    itemsize = jnp.dtype(dtype).itemsize
    sub = {4: 8, 2: 16, 1: 32}.get(itemsize, 8)
    dims = list(shape)
    if dims:
        dims[-1] = -(-dims[-1] // 128) * 128
    if len(dims) >= 2:
        dims[-2] = -(-dims[-2] // sub) * sub
    total = 1
    for d in dims:
        total *= d
    return total * itemsize


def _pick_q_tile(n, override=None):
    if override is not None and 0 < override <= n and n % override == 0:
        return override
    # TODO(synk): prefer 128 on v5e (4x128 MXU); 256 matches the 256-wide
    # v6e/v7x MXU. Non-divisible N falls back to a single full-length tile.
    for t in (256, 128, 64, 32, 16, 8):
        if t <= n and n % t == 0:
            return t
    return n


def masked_sab(x, mask, params, num_heads, q_tile=None):
    B, N, dim_in = x.shape
    dim_V = params["wo"].shape[0]
    assert dim_V % num_heads == 0, "dim_V must be divisible by num_heads"

    tq = _pick_q_tile(N, q_tile)
    n_qt = N // tq

    # X in bf16 with the mask appended as one extra feature lane (lane-dense
    # source for the in-kernel mask column; no separate (B, N, 1) input).
    x_aug = jnp.concatenate(
        [x.astype(jnp.bfloat16), mask.reshape(B, N, 1).astype(jnp.bfloat16)],
        axis=-1)                                               # (B, N, dim_in+1)
    mask_r = mask.reshape(B, 1, N).astype(jnp.float32)         # key mask, lane-dense

    # Fused Q|K|V weights (+ a zero row for the appended mask lane), bf16.
    w_qkv = jnp.concatenate([params["wq"], params["wk"], params["wv"]], axis=1)
    w_qkv = jnp.concatenate([w_qkv, jnp.zeros((1, 3 * dim_V), w_qkv.dtype)], axis=0)
    w_qkv = w_qkv.astype(jnp.bfloat16)                         # (dim_in+1, 3*dim_V)
    b_qkv = jnp.concatenate([params["bq"], params["bk"], params["bv"]],
                            axis=1).astype(jnp.float32)        # (1, 3*dim_V)
    w_o = params["wo"].astype(jnp.bfloat16)                    # (dim_V, dim_V)
    b_o = params["bo"].astype(jnp.float32)                     # (1, dim_V)

    kernel = functools.partial(masked_sab_kernel, num_heads=num_heads,
                               dim_V=dim_V, dim_in=dim_in, tq=tq)

    dia = dim_in + 1
    pb = _padded_vmem_bytes
    vmem_est = (
        # per-batch input blocks (pipeline keeps up to two buffers each)
        2 * pb((1, N, dia), jnp.bfloat16) + 2 * pb((1, 1, N), jnp.float32)
        # weights / biases (constant index_map -> resident, counted once)
        + pb((dia, 3 * dim_V), jnp.bfloat16) + pb((1, 3 * dim_V), jnp.float32)
        + pb((dim_V, dim_V), jnp.bfloat16) + pb((1, dim_V), jnp.float32)
        # double-buffered output tile
        + 2 * pb((1, tq, dim_V), x.dtype)
        # persistent scratch
        + pb((N, dim_V), jnp.float32) + pb((N, 2 * dim_V), jnp.bfloat16)
        + pb((N, 1), jnp.float32) + pb((tq, dim_V), jnp.float32)
        # live activation temporaries (qkv f32 at init; ~3 (Tq,N) f32 per step)
        + pb((N, 3 * dim_V), jnp.float32)
        + 3 * pb((tq, N), jnp.float32) + 2 * pb((tq, dim_V), jnp.float32)
    )
    try:
        vmem_cap = int(getattr(pltpu.get_tpu_info(), "vmem_capacity_bytes",
                               64 * 1024 * 1024))
    except Exception:
        vmem_cap = 64 * 1024 * 1024
    vmem_cap = max(vmem_cap, 64 * 1024 * 1024)
    vmem_limit = int(min(int(0.85 * vmem_cap),
                         max(32 * 1024 * 1024, int(1.25 * vmem_est))))

    flops = int(2 * B * N * dia * 3 * dim_V          # fused QKV projection
                + 4 * B * N * N * dim_V              # scores + attn @ V
                + 2 * B * N * dim_V * dim_V)         # fc_o
    transcendentals = int(B * num_heads * N * N)     # exp
    bytes_accessed = int(x_aug.size * 2 + mask_r.size * 4
                         + w_qkv.size * 2 + b_qkv.size * 4
                         + w_o.size * 2 + b_o.size * 4
                         + B * N * dim_V * jnp.dtype(x.dtype).itemsize)

    return pl.pallas_call(
        kernel,
        out_shape=jax.ShapeDtypeStruct((B, N, dim_V), x.dtype),
        grid=(B, n_qt),
        in_specs=[
            pl.BlockSpec((1, N, dia), lambda b, q: (b, 0, 0)),          # X|mask (bf16)
            pl.BlockSpec((1, 1, N), lambda b, q: (b, 0, 0)),            # key mask row
            pl.BlockSpec((dia, 3 * dim_V), lambda b, q: (0, 0)),        # fused W_qkv
            pl.BlockSpec((1, 3 * dim_V), lambda b, q: (0, 0)),          # fused b_qkv
            pl.BlockSpec((dim_V, dim_V), lambda b, q: (0, 0)),          # fc_o weight
            pl.BlockSpec((1, dim_V), lambda b, q: (0, 0)),              # fc_o bias
        ],
        out_specs=pl.BlockSpec((1, tq, dim_V), lambda b, q: (b, q, 0)),
        scratch_shapes=[
            pltpu.VMEM((N, dim_V), jnp.float32),       # Q (f32, residual), per batch
            pltpu.VMEM((N, 2 * dim_V), jnp.bfloat16),  # K|V (bf16), per batch
            pltpu.VMEM((N, 1), jnp.float32),           # mask column, per batch
            pltpu.VMEM((tq, dim_V), jnp.float32),      # per-tile head-concat output
        ],
        compiler_params=pltpu.CompilerParams(
            dimension_semantics=("parallel", "arbitrary"),
            vmem_limit_bytes=vmem_limit),
        cost_estimate=pl.CostEstimate(flops=flops,
                                      transcendentals=transcendentals,
                                      bytes_accessed=bytes_accessed),
    )(x_aug, mask_r, w_qkv, b_qkv, w_o, b_o)


def masked_sab_reference(x, mask, params, num_heads):
    """Plain-JAX (f32) replica of the PyTorch Masked_SAB forward, for verification."""
    B, N, _ = x.shape
    dim_V = params["wq"].shape[1]
    m = mask[..., None]
    q = (x @ params["wq"] + params["bq"]) * m
    k = (x @ params["wk"] + params["bk"]) * m
    v = (x @ params["wv"] + params["bv"]) * m
    ds = dim_V // num_heads
    outs = []
    for h in range(num_heads):
        qh = q[..., h * ds:(h + 1) * ds]
        kh = k[..., h * ds:(h + 1) * ds]
        vh = v[..., h * ds:(h + 1) * ds]
        s = jnp.einsum("bnd,bmd->bnm", qh, kh) / math.sqrt(dim_V)
        mx = jnp.max(s, axis=2, keepdims=True)
        m1 = mask[:, :, None]
        m2 = mask[:, None, :]
        xt = (s - mx) * m1 * m2
        num = jnp.exp(xt) * m1 * m2
        dem = jnp.sum(num, axis=2, keepdims=True)
        a = num / (dem + 1e-16)
        outs.append(qh + jnp.einsum("bnm,bmd->bnd", a, vh))
    o = jnp.concatenate(outs, axis=2)
    proj = (o @ params["wo"] + params["bo"]) * m
    return o + jnp.maximum(proj, 0.0)


def init_params(key, dim_in, dim_out):
    """Deterministic init matching PyTorch nn.Linear shapes (stored transposed)."""
    keys = jax.random.split(key, 8)

    def linear(kw, kb, fan_in, fan_out):
        bound = 1.0 / math.sqrt(fan_in)
        w = jax.random.uniform(kw, (fan_in, fan_out), jnp.float32, -bound, bound)
        b = jax.random.uniform(kb, (1, fan_out), jnp.float32, -bound, bound)
        return w, b

    wq, bq = linear(keys[0], keys[1], dim_in, dim_out)
    wk, bk = linear(keys[2], keys[3], dim_in, dim_out)
    wv, bv = linear(keys[4], keys[5], dim_in, dim_out)
    wo, bo = linear(keys[6], keys[7], dim_out, dim_out)
    return {"wq": wq, "bq": bq, "wk": wk, "bk": bk,
            "wv": wv, "bv": bv, "wo": wo, "bo": bo}


if __name__ == "__main__":
    key = jax.random.PRNGKey(0)
    k1, k2, k3, k4, k5 = jax.random.split(key, 5)

    # --- test 1: small shapes, single query tile ---
    B, N, dim_in, dim_out, num_heads = 2, 8, 16, 32, 4
    x = jax.random.normal(k1, (B, N, dim_in), dtype=jnp.float32)
    mask = (jax.random.uniform(k2, (B, N)) > 0.3).astype(jnp.float32)
    params = init_params(k3, dim_in, dim_out)

    out = jax.block_until_ready(masked_sab(x, mask, params, num_heads))
    ref = masked_sab_reference(x, mask, params, num_heads)
    assert out.shape == (B, N, dim_out)
    assert jnp.allclose(out, ref, atol=5e-2, rtol=5e-2), "mismatch vs reference (test 1)"

    # --- test 2: exercises the query-tile grid axis (N=64, Tq=16 -> 4 q tiles) ---
    B2, N2 = 2, 64
    x2 = jax.random.normal(k4, (B2, N2, dim_in), dtype=jnp.float32)
    mask2 = (jax.random.uniform(k5, (B2, N2)) > 0.3).astype(jnp.float32)

    out2 = jax.block_until_ready(masked_sab(x2, mask2, params, num_heads, q_tile=16))
    ref2 = masked_sab_reference(x2, mask2, params, num_heads)
    assert out2.shape == (B2, N2, dim_out)
    assert jnp.allclose(out2, ref2, atol=1e-1, rtol=5e-2), "mismatch vs reference (test 2)"

    print("KERNEL_OK")
</pallas_src>

<mosaic_0001>
module attributes {stable_mosaic.version = 11 : i64} {
  func.func @masked_sab_kernel(%arg0: i32, %arg1: i32, %arg2: memref<1x8x17xbf16, #tpu.memory_space<vmem>>, %arg3: memref<1x1x8xf32, #tpu.memory_space<vmem>>, %arg4: memref<17x96xbf16, #tpu.memory_space<vmem>>, %arg5: memref<1x96xf32, #tpu.memory_space<vmem>>, %arg6: memref<32x32xbf16, #tpu.memory_space<vmem>>, %arg7: memref<1x32xf32, #tpu.memory_space<vmem>>, %arg8: memref<1x8x32xf32, #tpu.memory_space<vmem>>, %arg9: memref<8x32xf32, #tpu.memory_space<vmem>>, %arg10: memref<8x64xbf16, #tpu.memory_space<vmem>>, %arg11: memref<8x1xf32, #tpu.memory_space<vmem>>, %arg12: memref<8x32xf32, #tpu.memory_space<vmem>>) attributes {dimension_semantics = [#tpu.dimension_semantics<parallel>, #tpu.dimension_semantics<arbitrary>], iteration_bounds = array<i64: 2, 1>, scalar_prefetch = 0 : i64, scratch_operands = 4 : i64, tpu.core_type = #tpu.core_type<tc>, window_params = [{transform_indices = @transform_0, window_bounds = array<i64: 1, 8, 17>}, {transform_indices = @transform_1, window_bounds = array<i64: 1, 1, 8>}, {pipeline_mode = #tpu.pipeline_mode<synchronous>, transform_indices = @transform_2, window_bounds = array<i64: 17, 96>}, {pipeline_mode = #tpu.pipeline_mode<synchronous>, transform_indices = @transform_3, window_bounds = array<i64: 1, 96>}, {pipeline_mode = #tpu.pipeline_mode<synchronous>, transform_indices = @transform_4, window_bounds = array<i64: 32, 32>}, {pipeline_mode = #tpu.pipeline_mode<synchronous>, transform_indices = @transform_5, window_bounds = array<i64: 1, 32>}, {transform_indices = @transform_6, window_bounds = array<i64: 1, 8, 32>}]} {
    %c0_i32 = arith.constant 0 : i32
    %0 = arith.cmpi eq, %arg1, %c0_i32 : i32
    %1 = arith.extui %0 : i1 to i32
    %c0_i32_0 = arith.constant 0 : i32
    %2 = arith.cmpi ne, %1, %c0_i32_0 : i32
    scf.if %2 {
      %c0_61 = arith.constant 0 : index
      %c0_62 = arith.constant 0 : index
      %c0_63 = arith.constant 0 : index
      %136 = vector.load %arg2[%c0_61, %c0_62, %c0_63] : memref<1x8x17xbf16, #tpu.memory_space<vmem>>, vector<1x8x17xbf16>
      %137 = vector.shape_cast %136 : vector<1x8x17xbf16> to vector<8x17xbf16>
      %138 = vector.extract_strided_slice %137 {offsets = [0, 16], sizes = [8, 1], strides = [1, 1]} : vector<8x17xbf16> to vector<8x1xbf16>
      %139 = arith.extf %138 : vector<8x1xbf16> to vector<8x1xf32>
      %c0_64 = arith.constant 0 : index
      %c0_65 = arith.constant 0 : index
      %140 = vector.load %arg11[%c0_64, %c0_65] : memref<8x1xf32, #tpu.memory_space<vmem>>, vector<8x1xf32>
      tpu.vector_store %arg11[%c0_64, %c0_65], %139 {strides = array<i32>} : memref<8x1xf32, #tpu.memory_space<vmem>>, vector<8x1xf32>,
      %c0_66 = arith.constant 0 : index
      %c0_67 = arith.constant 0 : index
      %141 = vector.load %arg4[%c0_66, %c0_67] : memref<17x96xbf16, #tpu.memory_space<vmem>>, vector<17x96xbf16>
      %cst_68 = arith.constant dense<0.000000e+00> : vector<8x96xf32>
      %142 = tpu.matmul %137, %141, %cst_68 {dimension_numbers = #tpu.dot_dimension_numbers<[1], [0], [0], [1], [0, 0, 1, 1], [], []>} : vector<8x17xbf16>, vector<17x96xbf16>, vector<8x96xf32> -> vector<8x96xf32>
      %c0_69 = arith.constant 0 : index
      %c0_70 = arith.constant 0 : index
      %143 = vector.load %arg5[%c0_69, %c0_70] : memref<1x96xf32, #tpu.memory_space<vmem>>, vector<1x96xf32>
      %144 = vector.broadcast %143 : vector<1x96xf32> to vector<8x96xf32>
      %145 = arith.addf %142, %144 : vector<8x96xf32>
      %146 = vector.broadcast %139 : vector<8x1xf32> to vector<8x96xf32>
      %147 = arith.mulf %145, %146 : vector<8x96xf32>
      %148 = vector.extract_strided_slice %147 {offsets = [0, 0], sizes = [8, 32], strides = [1, 1]} : vector<8x96xf32> to vector<8x32xf32>
      %c0_71 = arith.constant 0 : index
      %c0_72 = arith.constant 0 : index
      %149 = vector.load %arg9[%c0_71, %c0_72] : memref<8x32xf32, #tpu.memory_space<vmem>>, vector<8x32xf32>
      tpu.vector_store %arg9[%c0_71, %c0_72], %148 {strides = array<i32>} : memref<8x32xf32, #tpu.memory_space<vmem>>, vector<8x32xf32>,
      %150 = vector.extract_strided_slice %147 {offsets = [0, 32], sizes = [8, 64], strides = [1, 1]} : vector<8x96xf32> to vector<8x64xf32>
      %151 = arith.truncf %150 : vector<8x64xf32> to vector<8x64xbf16>
      %c0_73 = arith.constant 0 : index
      %c0_74 = arith.constant 0 : index
      %152 = vector.load %arg10[%c0_73, %c0_74] : memref<8x64xbf16, #tpu.memory_space<vmem>>, vector<8x64xbf16>
      tpu.vector_store %arg10[%c0_73, %c0_74], %151 {strides = array<i32>} : memref<8x64xbf16, #tpu.memory_space<vmem>>, vector<8x64xbf16>,
    } else {
    }
    %c8_i32 = arith.constant 8 : i32
    %3 = arith.muli %arg1, %c8_i32 : i32
    %4 = tpu.assume_multiple %3, 8 : i32
    %5 = arith.index_cast %4 : i32 to index
    %c0 = arith.constant 0 : index
    %6 = vector.load %arg9[%5, %c0] : memref<8x32xf32, #tpu.memory_space<vmem>>, vector<8x32xf32>
    %7 = arith.index_cast %4 : i32 to index
    %c0_1 = arith.constant 0 : index
    %8 = vector.load %arg11[%7, %c0_1] : memref<8x1xf32, #tpu.memory_space<vmem>>, vector<8x1xf32>
    %c0_2 = arith.constant 0 : index
    %c0_3 = arith.constant 0 : index
    %c0_4 = arith.constant 0 : index
    %9 = vector.load %arg3[%c0_2, %c0_3, %c0_4] : memref<1x1x8xf32, #tpu.memory_space<vmem>>, vector<1x1x8xf32>
    %10 = vector.shape_cast %9 : vector<1x1x8xf32> to vector<1x8xf32>
    %11 = vector.broadcast %8 : vector<8x1xf32> to vector<8x8xf32>
    %12 = vector.broadcast %10 : vector<1x8xf32> to vector<8x8xf32>
    %13 = arith.mulf %11, %12 : vector<8x8xf32>
    %cst = arith.constant 0.176776692 : f32
    %14 = vector.broadcast %cst : f32 to vector<8x32xf32>
    %15 = arith.mulf %6, %14 : vector<8x32xf32>
    %16 = arith.truncf %15 : vector<8x32xf32> to vector<8x32xbf16>
    %17 = vector.extract_strided_slice %16 {offsets = [0, 0], sizes = [8, 8], strides = [1, 1]} : vector<8x32xbf16> to vector<8x8xbf16>
    %c0_5 = arith.constant 0 : index
    %c0_6 = arith.constant 0 : index
    %18 = vector.load %arg10[%c0_5, %c0_6] : memref<8x64xbf16, #tpu.memory_space<vmem>>, vector<8x8xbf16>
    %c0_7 = arith.constant 0 : index
    %c32 = arith.constant 32 : index
    %19 = vector.load %arg10[%c0_7, %c32] : memref<8x64xbf16, #tpu.memory_space<vmem>>, vector<8x8xbf16>
    "tpu.trace_start"() <{level = 10 : i32, message = "qd,kd->qk"}> : () -> ()
    %cst_8 = arith.constant dense<0.000000e+00> : vector<8x8xf32>
    %20 = tpu.matmul %17, %18, %cst_8 {dimension_numbers = #tpu.dot_dimension_numbers<[1], [1], [0], [0], [0, 0, 1, 0], [], []>} : vector<8x8xbf16>, vector<8x8xbf16>, vector<8x8xf32> -> vector<8x8xf32>
    "tpu.trace_stop"() : () -> ()
    %cst_9 = arith.constant dense<0xFF800000> : vector<8xf32>
    %21 = vector.multi_reduction <maximumf>, %20, %cst_9 [1] : vector<8x8xf32> to vector<8xf32>
    %22 = vector.shape_cast %21 : vector<8xf32> to vector<8x1xf32>
    %23 = vector.broadcast %22 : vector<8x1xf32> to vector<8x8xf32>
    %24 = arith.subf %20, %23 : vector<8x8xf32>
    %25 = math.exp %24 : vector<8x8xf32>
    %26 = arith.mulf %25, %13 : vector<8x8xf32>
    %cst_10 = arith.constant dense<0.000000e+00> : vector<8xf32>
    %27 = vector.multi_reduction <add>, %26, %cst_10 [1] : vector<8x8xf32> to vector<8xf32>
    %28 = vector.shape_cast %27 : vector<8xf32> to vector<8x1xf32>
    %cst_11 = arith.constant 0.000000e+00 : f32
    %29 = vector.broadcast %cst_11 : f32 to vector<8x1xf32>
    %30 = arith.cmpf ogt, %28, %29 : vector<8x1xf32>
    %cst_12 = arith.constant 1.000000e-16 : f32
    %31 = vector.broadcast %cst_12 : f32 to vector<8x1xf32>
    %32 = arith.addf %28, %31 : vector<8x1xf32>
    %33 = tpu.reciprocal %32 {approx = true} : vector<8x1xf32> -> vector<8x1xf32>
    %cst_13 = arith.constant 0.000000e+00 : f32
    %34 = vector.broadcast %cst_13 : f32 to vector<8x1xf32>
    %35 = arith.select %30, %33, %34 : vector<8x1xi1>, vector<8x1xf32>
    %36 = vector.broadcast %35 : vector<8x1xf32> to vector<8x8xf32>
    %37 = arith.mulf %26, %36 : vector<8x8xf32>
    %38 = arith.truncf %37 : vector<8x8xf32> to vector<8x8xbf16>
    %cst_14 = arith.constant dense<0.000000e+00> : vector<8x8xf32>
    %39 = tpu.matmul %38, %19, %cst_14 {dimension_numbers = #tpu.dot_dimension_numbers<[1], [0], [0], [1], [0, 0, 1, 1], [], []>} : vector<8x8xbf16>, vector<8x8xbf16>, vector<8x8xf32> -> vector<8x8xf32>
    %40 = vector.extract_strided_slice %6 {offsets = [0, 0], sizes = [8, 8], strides = [1, 1]} : vector<8x32xf32> to vector<8x8xf32>
    %41 = arith.addf %40, %39 : vector<8x8xf32>
    %c0_15 = arith.constant 0 : index
    %c0_16 = arith.constant 0 : index
    %42 = vector.load %arg12[%c0_15, %c0_16] : memref<8x32xf32, #tpu.memory_space<vmem>>, vector<8x8xf32>
    tpu.vector_store %arg12[%c0_15, %c0_16], %41 {strides = array<i32>} : memref<8x32xf32, #tpu.memory_space<vmem>>, vector<8x8xf32>,
    %43 = vector.extract_strided_slice %16 {offsets = [0, 8], sizes = [8, 8], strides = [1, 1]} : vector<8x32xbf16> to vector<8x8xbf16>
    %c0_17 = arith.constant 0 : index
    %c8 = arith.constant 8 : index
    %44 = vector.load %arg10[%c0_17, %c8] : memref<8x64xbf16, #tpu.memory_space<vmem>>, vector<8x8xbf16>
    %c0_18 = arith.constant 0 : index
    %c40 = arith.constant 40 : index
    %45 = vector.load %arg10[%c0_18, %c40] : memref<8x64xbf16, #tpu.memory_space<vmem>>, vector<8x8xbf16>
    "tpu.trace_start"() <{level = 10 : i32, message = "qd,kd->qk"}> : () -> ()
    %cst_19 = arith.constant dense<0.000000e+00> : vector<8x8xf32>
    %46 = tpu.matmul %43, %44, %cst_19 {dimension_numbers = #tpu.dot_dimension_numbers<[1], [1], [0], [0], [0, 0, 1, 0], [], []>} : vector<8x8xbf16>, vector<8x8xbf16>, vector<8x8xf32> -> vector<8x8xf32>
    "tpu.trace_stop"() : () -> ()
    %cst_20 = arith.constant dense<0xFF800000> : vector<8xf32>
    %47 = vector.multi_reduction <maximumf>, %46, %cst_20 [1] : vector<8x8xf32> to vector<8xf32>
    %48 = vector.shape_cast %47 : vector<8xf32> to vector<8x1xf32>
    %49 = vector.broadcast %48 : vector<8x1xf32> to vector<8x8xf32>
    %50 = arith.subf %46, %49 : vector<8x8xf32>
    %51 = math.exp %50 : vector<8x8xf32>
    %52 = arith.mulf %51, %13 : vector<8x8xf32>
    %cst_21 = arith.constant dense<0.000000e+00> : vector<8xf32>
    %53 = vector.multi_reduction <add>, %52, %cst_21 [1] : vector<8x8xf32> to vector<8xf32>
    %54 = vector.shape_cast %53 : vector<8xf32> to vector<8x1xf32>
    %cst_22 = arith.constant 0.000000e+00 : f32
    %55 = vector.broadcast %cst_22 : f32 to vector<8x1xf32>
    %56 = arith.cmpf ogt, %54, %55 : vector<8x1xf32>
    %cst_23 = arith.constant 1.000000e-16 : f32
    %57 = vector.broadcast %cst_23 : f32 to vector<8x1xf32>
    %58 = arith.addf %54, %57 : vector<8x1xf32>
    %59 = tpu.reciprocal %58 {approx = true} : vector<8x1xf32> -> vector<8x1xf32>
    %cst_24 = arith.constant 0.000000e+00 : f32
    %60 = vector.broadcast %cst_24 : f32 to vector<8x1xf32>
    %61 = arith.select %56, %59, %60 : vector<8x1xi1>, vector<8x1xf32>
    %62 = vector.broadcast %61 : vector<8x1xf32> to vector<8x8xf32>
    %63 = arith.mulf %52, %62 : vector<8x8xf32>
    %64 = arith.truncf %63 : vector<8x8xf32> to vector<8x8xbf16>
    %cst_25 = arith.constant dense<0.000000e+00> : vector<8x8xf32>
    %65 = tpu.matmul %64, %45, %cst_25 {dimension_numbers = #tpu.dot_dimension_numbers<[1], [0], [0], [1], [0, 0, 1, 1], [], []>} : vector<8x8xbf16>, vector<8x8xbf16>, vector<8x8xf32> -> vector<8x8xf32>
    %66 = vector.extract_strided_slice %6 {offsets = [0, 8], sizes = [8, 8], strides = [1, 1]} : vector<8x32xf32> to vector<8x8xf32>
    %67 = arith.addf %66, %65 : vector<8x8xf32>
    %c0_26 = arith.constant 0 : index
    %c8_27 = arith.constant 8 : index
    %68 = vector.load %arg12[%c0_26, %c8_27] : memref<8x32xf32, #tpu.memory_space<vmem>>, vector<8x8xf32>
    tpu.vector_store %arg12[%c0_26, %c8_27], %67 {strides = array<i32>} : memref<8x32xf32, #tpu.memory_space<vmem>>, vector<8x8xf32>,
    %69 = vector.extract_strided_slice %16 {offsets = [0, 16], sizes = [8, 8], strides = [1, 1]} : vector<8x32xbf16> to vector<8x8xbf16>
    %c0_28 = arith.constant 0 : index
    %c16 = arith.constant 16 : index
    %70 = vector.load %arg10[%c0_28, %c16] : memref<8x64xbf16, #tpu.memory_space<vmem>>, vector<8x8xbf16>
    %c0_29 = arith.constant 0 : index
    %c48 = arith.constant 48 : index
    %71 = vector.load %arg10[%c0_29, %c48] : memref<8x64xbf16, #tpu.memory_space<vmem>>, vector<8x8xbf16>
    "tpu.trace_start"() <{level = 10 : i32, message = "qd,kd->qk"}> : () -> ()
    %cst_30 = arith.constant dense<0.000000e+00> : vector<8x8xf32>
    %72 = tpu.matmul %69, %70, %cst_30 {dimension_numbers = #tpu.dot_dimension_numbers<[1], [1], [0], [0], [0, 0, 1, 0], [], []>} : vector<8x8xbf16>, vector<8x8xbf16>, vector<8x8xf32> -> vector<8x8xf32>
    "tpu.trace_stop"() : () -> ()
    %cst_31 = arith.constant dense<0xFF800000> : vector<8xf32>
    %73 = vector.multi_reduction <maximumf>, %72, %cst_31 [1] : vector<8x8xf32> to vector<8xf32>
    %74 = vector.shape_cast %73 : vector<8xf32> to vector<8x1xf32>
    %75 = vector.broadcast %74 : vector<8x1xf32> to vector<8x8xf32>
    %76 = arith.subf %72, %75 : vector<8x8xf32>
    %77 = math.exp %76 : vector<8x8xf32>
    %78 = arith.mulf %77, %13 : vector<8x8xf32>
    %cst_32 = arith.constant dense<0.000000e+00> : vector<8xf32>
    %79 = vector.multi_reduction <add>, %78, %cst_32 [1] : vector<8x8xf32> to vector<8xf32>
    %80 = vector.shape_cast %79 : vector<8xf32> to vector<8x1xf32>
    %cst_33 = arith.constant 0.000000e+00 : f32
    %81 = vector.broadcast %cst_33 : f32 to vector<8x1xf32>
    %82 = arith.cmpf ogt, %80, %81 : vector<8x1xf32>
    %cst_34 = arith.constant 1.000000e-16 : f32
    %83 = vector.broadcast %cst_34 : f32 to vector<8x1xf32>
    %84 = arith.addf %80, %83 : vector<8x1xf32>
    %85 = tpu.reciprocal %84 {approx = true} : vector<8x1xf32> -> vector<8x1xf32>
    %cst_35 = arith.constant 0.000000e+00 : f32
    %86 = vector.broadcast %cst_35 : f32 to vector<8x1xf32>
    %87 = arith.select %82, %85, %86 : vector<8x1xi1>, vector<8x1xf32>
    %88 = vector.broadcast %87 : vector<8x1xf32> to vector<8x8xf32>
    %89 = arith.mulf %78, %88 : vector<8x8xf32>
    %90 = arith.truncf %89 : vector<8x8xf32> to vector<8x8xbf16>
    %cst_36 = arith.constant dense<0.000000e+00> : vector<8x8xf32>
    %91 = tpu.matmul %90, %71, %cst_36 {dimension_numbers = #tpu.dot_dimension_numbers<[1], [0], [0], [1], [0, 0, 1, 1], [], []>} : vector<8x8xbf16>, vector<8x8xbf16>, vector<8x8xf32> -> vector<8x8xf32>
    %92 = vector.extract_strided_slice %6 {offsets = [0, 16], sizes = [8, 8], strides = [1, 1]} : vector<8x32xf32> to vector<8x8xf32>
    %93 = arith.addf %92, %91 : vector<8x8xf32>
    %c0_37 = arith.constant 0 : index
    %c16_38 = arith.constant 16 : index
    %94 = vector.load %arg12[%c0_37, %c16_38] : memref<8x32xf32, #tpu.memory_space<vmem>>, vector<8x8xf32>
    tpu.vector_store %arg12[%c0_37, %c16_38], %93 {strides = array<i32>} : memref<8x32xf32, #tpu.memory_space<vmem>>, vector<8x8xf32>,
    %95 = vector.extract_strided_slice %16 {offsets = [0, 24], sizes = [8, 8], strides = [1, 1]} : vector<8x32xbf16> to vector<8x8xbf16>
    %c0_39 = arith.constant 0 : index
    %c24 = arith.constant 24 : index
    %96 = vector.load %arg10[%c0_39, %c24] : memref<8x64xbf16, #tpu.memory_space<vmem>>, vector<8x8xbf16>
    %c0_40 = arith.constant 0 : index
    %c56 = arith.constant 56 : index
    %97 = vector.load %arg10[%c0_40, %c56] : memref<8x64xbf16, #tpu.memory_space<vmem>>, vector<8x8xbf16>
    "tpu.trace_start"() <{level = 10 : i32, message = "qd,kd->qk"}> : () -> ()
    %cst_41 = arith.constant dense<0.000000e+00> : vector<8x8xf32>
    %98 = tpu.matmul %95, %96, %cst_41 {dimension_numbers = #tpu.dot_dimension_numbers<[1], [1], [0], [0], [0, 0, 1, 0], [], []>} : vector<8x8xbf16>, vector<8x8xbf16>, vector<8x8xf32> -> vector<8x8xf32>
    "tpu.trace_stop"() : () -> ()
    %cst_42 = arith.constant dense<0xFF800000> : vector<8xf32>
    %99 = vector.multi_reduction <maximumf>, %98, %cst_42 [1] : vector<8x8xf32> to vector<8xf32>
    %100 = vector.shape_cast %99 : vector<8xf32> to vector<8x1xf32>
    %101 = vector.broadcast %100 : vector<8x1xf32> to vector<8x8xf32>
    %102 = arith.subf %98, %101 : vector<8x8xf32>
    %103 = math.exp %102 : vector<8x8xf32>
    %104 = arith.mulf %103, %13 : vector<8x8xf32>
    %cst_43 = arith.constant dense<0.000000e+00> : vector<8xf32>
    %105 = vector.multi_reduction <add>, %104, %cst_43 [1] : vector<8x8xf32> to vector<8xf32>
    %106 = vector.shape_cast %105 : vector<8xf32> to vector<8x1xf32>
    %cst_44 = arith.constant 0.000000e+00 : f32
    %107 = vector.broadcast %cst_44 : f32 to vector<8x1xf32>
    %108 = arith.cmpf ogt, %106, %107 : vector<8x1xf32>
    %cst_45 = arith.constant 1.000000e-16 : f32
    %109 = vector.broadcast %cst_45 : f32 to vector<8x1xf32>
    %110 = arith.addf %106, %109 : vector<8x1xf32>
    %111 = tpu.reciprocal %110 {approx = true} : vector<8x1xf32> -> vector<8x1xf32>
    %cst_46 = arith.constant 0.000000e+00 : f32
    %112 = vector.broadcast %cst_46 : f32 to vector<8x1xf32>
    %113 = arith.select %108, %111, %112 : vector<8x1xi1>, vector<8x1xf32>
    %114 = vector.broadcast %113 : vector<8x1xf32> to vector<8x8xf32>
    %115 = arith.mulf %104, %114 : vector<8x8xf32>
    %116 = arith.truncf %115 : vector<8x8xf32> to vector<8x8xbf16>
    %cst_47 = arith.constant dense<0.000000e+00> : vector<8x8xf32>
    %117 = tpu.matmul %116, %97, %cst_47 {dimension_numbers = #tpu.dot_dimension_numbers<[1], [0], [0], [1], [0, 0, 1, 1], [], []>} : vector<8x8xbf16>, vector<8x8xbf16>, vector<8x8xf32> -> vector<8x8xf32>
    %118 = vector.extract_strided_slice %6 {offsets = [0, 24], sizes = [8, 8], strides = [1, 1]} : vector<8x32xf32> to vector<8x8xf32>
    %119 = arith.addf %118, %117 : vector<8x8xf32>
    %c0_48 = arith.constant 0 : index
    %c24_49 = arith.constant 24 : index
    %120 = vector.load %arg12[%c0_48, %c24_49] : memref<8x32xf32, #tpu.memory_space<vmem>>, vector<8x8xf32>
    tpu.vector_store %arg12[%c0_48, %c24_49], %119 {strides = array<i32>} : memref<8x32xf32, #tpu.memory_space<vmem>>, vector<8x8xf32>,
    %c0_50 = arith.constant 0 : index
    %c0_51 = arith.constant 0 : index
    %121 = vector.load %arg12[%c0_50, %c0_51] : memref<8x32xf32, #tpu.memory_space<vmem>>, vector<8x32xf32>
    %122 = arith.truncf %121 : vector<8x32xf32> to vector<8x32xbf16>
    %c0_52 = arith.constant 0 : index
    %c0_53 = arith.constant 0 : index
    %123 = vector.load %arg6[%c0_52, %c0_53] : memref<32x32xbf16, #tpu.memory_space<vmem>>, vector<32x32xbf16>
    %cst_54 = arith.constant dense<0.000000e+00> : vector<8x32xf32>
    %124 = tpu.matmul %122, %123, %cst_54 {dimension_numbers = #tpu.dot_dimension_numbers<[1], [0], [0], [1], [0, 0, 1, 1], [], []>} : vector<8x32xbf16>, vector<32x32xbf16>, vector<8x32xf32> -> vector<8x32xf32>
    %c0_55 = arith.constant 0 : index
    %c0_56 = arith.constant 0 : index
    %125 = vector.load %arg7[%c0_55, %c0_56] : memref<1x32xf32, #tpu.memory_space<vmem>>, vector<1x32xf32>
    %126 = vector.broadcast %125 : vector<1x32xf32> to vector<8x32xf32>
    %127 = arith.addf %124, %126 : vector<8x32xf32>
    %128 = vector.broadcast %8 : vector<8x1xf32> to vector<8x32xf32>
    %129 = arith.mulf %127, %128 : vector<8x32xf32>
    %cst_57 = arith.constant 0.000000e+00 : f32
    %130 = vector.broadcast %cst_57 : f32 to vector<8x32xf32>
    %131 = arith.maximumf %129, %130 : vector<8x32xf32>
    %132 = arith.addf %121, %131 : vector<8x32xf32>
    %c0_58 = arith.constant 0 : index
    %c0_59 = arith.constant 0 : index
    %c0_60 = arith.constant 0 : index
    %133 = vector.load %arg8[%c0_58, %c0_59, %c0_60] : memref<1x8x32xf32, #tpu.memory_space<vmem>>, vector<1x8x32xf32>
    %134 = vector.shape_cast %133 : vector<1x8x32xf32> to vector<8x32xf32>
    %135 = vector.shape_cast %132 : vector<8x32xf32> to vector<1x8x32xf32>
    tpu.vector_store %arg8[%c0_58, %c0_59, %c0_60], %135 {strides = array<i32>} : memref<1x8x32xf32, #tpu.memory_space<vmem>>, vector<1x8x32xf32>,
    return
  }
  func.func @transform_0(%arg0: i32, %arg1: i32) -> (i32, i32, i32) {
    %c0_i32 = arith.constant 0 : i32
    %c0_i32_0 = arith.constant 0 : i32
    %c0_i32_1 = arith.constant 0 : i32
    return %arg0, %c0_i32, %c0_i32_0 : i32, i32, i32
  }
  func.func @transform_1(%arg0: i32, %arg1: i32) -> (i32, i32, i32) {
    %c0_i32 = arith.constant 0 : i32
    %c0_i32_0 = arith.constant 0 : i32
    %c0_i32_1 = arith.constant 0 : i32
    return %arg0, %c0_i32, %c0_i32_0 : i32, i32, i32
  }
  func.func @transform_2(%arg0: i32, %arg1: i32) -> (i32, i32) {
    %c0_i32 = arith.constant 0 : i32
    %c0_i32_0 = arith.constant 0 : i32
    %c0_i32_1 = arith.constant 0 : i32
    return %c0_i32, %c0_i32_0 : i32, i32
  }
  func.func @transform_3(%arg0: i32, %arg1: i32) -> (i32, i32) {
    %c0_i32 = arith.constant 0 : i32
    %c0_i32_0 = arith.constant 0 : i32
    %c0_i32_1 = arith.constant 0 : i32
    return %c0_i32, %c0_i32_0 : i32, i32
  }
  func.func @transform_4(%arg0: i32, %arg1: i32) -> (i32, i32) {
    %c0_i32 = arith.constant 0 : i32
    %c0_i32_0 = arith.constant 0 : i32
    %c0_i32_1 = arith.constant 0 : i32
    return %c0_i32, %c0_i32_0 : i32, i32
  }
  func.func @transform_5(%arg0: i32, %arg1: i32) -> (i32, i32) {
    %c0_i32 = arith.constant 0 : i32
    %c0_i32_0 = arith.constant 0 : i32
    %c0_i32_1 = arith.constant 0 : i32
    return %c0_i32, %c0_i32_0 : i32, i32
  }
  func.func @transform_6(%arg0: i32, %arg1: i32) -> (i32, i32, i32) {
    %c0_i32 = arith.constant 0 : i32
    %c0_i32_0 = arith.constant 0 : i32
    return %arg0, %arg1, %c0_i32 : i32, i32, i32
  }
}

</mosaic_0001>

<bundles_post_ra>
// kernel: tpu_custom_call.1
= control target key start
LH: loop header
LB: loop body
LE: loop exit
PB: predicated region body
PF: predicated region fallthrough
CT: control target
= control target key end

     0   :  { %11 = vsyncpa [#allocation7], 0  ;;  %s1972_s0 = inlined_call_operand.hbm [shape: bf16[2,8,17], index: 0, kind: input, shape index: {}]   ;;  %s1973_s1 = inlined_call_operand.vmem [shape: f32[2,1,8], index: 1, kind: input, shape index: {}]   ;;  %s1974_s2 = inlined_call_operand.hbm [shape: bf16[17,96], index: 2, kind: input, shape index: {}]   ;;  %s1975_s3 = inlined_call_operand.vmem [shape: f32[1,96], index: 3, kind: input, shape index: {}]   ;;  %s1976_s4 = inlined_call_operand.hbm [shape: bf16[32,32], index: 4, kind: input, shape index: {}]   ;;  %s1977_s5 = inlined_call_operand.vmem [shape: f32[1,32], index: 5, kind: input, shape index: {}]   ;;  %s1978_s6 = inlined_call_operand.hbm [shape: f32[2,8,32], index: 6, kind: output, shape index: {}]  }
   0x1   :  { %13 = vsyncpa [#allocation7 + $0x1], 0 }
   0x2   :  { %14 = vsyncpa [#allocation10], 0 }
   0x3   :  { %15 = vsyncpa [#allocation8], 0 }
   0x4   :  { %17 = vsyncpa [#allocation8 + $0x1], 0  ;;  %s1616_s21 = smov 0   ;;  %s1618_s22 = smov 0  }
   0x5   :  { %s1620_s23 = smov 0   ;;  %s1622_s24 = smov 0  }
   0x6   :  { %s1624_s25 = smov 0   ;;  %s1626_s26 = smov 0  }
   0x7 LB: > { %s1135_s27 = sadd.s32 4294967295, %s1559_s26   ;;  %s1136_s28 = sadd.s32 4294967294, %s1559_s26   ;;  %s1559_s26 = sphi %s1626_s26, %s23_s26   ;;  %s1555_s25 = sphi %s1624_s25, %s2003_s25   ;;  %s1551_s24 = sphi %s1622_s24, %s2002_s24   ;;  %s1547_s23 = sphi %s1620_s23, %s2001_s23   ;;  %s1543_s22 = sphi %s1618_s22, %s2000_s22   ;;  %s1539_s21 = sphi %s1616_s21, %s1999_s21  }
   0x8   : > { %p55_p0 = scmp.ne.s32.totalorder %s1543_s22, %s1539_s21  ;;  %p1650_p1 = scmp.eq.s32.totalorder %s1135_s27, 0 }
   0x9   : > { %p1654_p2 = scmp.eq.s32.totalorder %s1135_s27, 1  ;;  %p197_p3 = scmp.eq.s32.totalorder %s1136_s28, 1 }
   0xa   : > { %s1984_s29 = scalar_select %p1650_p1, 1, 0 }
   0xb   : > { %p1660_p4 = por %p1650_p1, %p55_p0  ;;  %p1137_p5 = scmp.ge.s32.totalorder %s1559_s26, 1 }
   0xc   : > { %p1665_p6 = por %p197_p3, %p55_p0  ;;  %p204_p7 = scmp.lt.s32.totalorder %s1559_s26, 3 }
   0xd   : > { %s1986_s7 = scalar_select %p1660_p4, 1, 0 }
   0xe   : > { %s1987_s8 = scalar_select %p1665_p6, 1, 0 }
   0xf   : > { %p1670_p8 = pnand %p1137_p5, %p204_p7  ;;  %s1561_s10 = smov [#allocation9]  }
  0x10   : > { %1988 = sst [smem:[#allocation16_spill]] %s1987_s8  ;;  %s216_s11 = sshll.u32 %s1561_s10, 4  ;;  %s1674_s11 = int_to_ptr.vmem [resolvable:$true] %s216_s11 }
  0x11   : > { %p1273_p9 = pneg %p1670_p8  ;;  %s1562_s13 = smov [#allocation11]  }
  0x12   : > { %s232_s14 = sshll.u32 %s1562_s13, 4  ;;  %s1387_s17 = scalar_lea.hbm %s1974_s2, 192  ;;  %s1685_s14 = int_to_ptr.vmem [resolvable:$true] %s232_s14 }
  0x13   : > { %p1681_p11 = pnand %p1273_p9, %p1650_p1  ;;  %p1388_p12 = scmp.ne.s32.totalorder %s1974_s2, %s1387_s17 }
  0x14   : > { %p1394_p5 = scmp.lt.u32.totalorder %s1387_s17, %s1974_s2 }
  0x15   : > { %p1389_p13 = pneg %p1681_p11 }
  0x17   : > { %p1390_p0 = pnand %p1389_p13, %p1388_p12 }
  0x19   : > { %p1391_p3 = pneg %p1390_p0 }
  0x1b   : > { %p1396_p7 = pnand %p1394_p5, %p1391_p3 }
  0x1d   : > { %1399 = shalt.err (!%p1396_p7)
}
  0x1e   : > { %s1400_s28 = scalar_lea.vmem %s1674_s11, 192  ;;  %p1408_p1 = scmp.lt.s32.totalorder %s1674_s11, %s1674_s11 }
  0x1f   : > { %p1401_p9 = scmp.ne.s32.totalorder %s1674_s11, %s1400_s28  ;;  %p1409_p12 = scmp.lt.s32.totalorder %s1400_s28, %s1400_s28 }
  0x21   : > { %p1403_p10 = pnand %p1401_p9, %p1389_p13  ;;  %p1410_p0 = por %p1409_p12, %p1408_p1 }
  0x23   : > { %p1404_p6 = pneg %p1403_p10 }
  0x25   : > { %p1411_p4 = pnand %p1410_p0, %p1404_p6 }
  0x27   : > { %1414 = shalt.err (!%p1411_p4)
}
  0x28   : > { %s1563_s10 = smov 64   ;;  %s1564_s13 = smov 4  }
  0x29   : > { %1276 = dma.hbm_to_vmem [thread:$0]  (!%p1681_p11), %s1974_s2, 192, %s1674_s11, [#allocation10], %s1563_s10, %s1563_s10, %s1564_s13  }
  0x2a   : > { %s1415_s19 = scalar_lea.hbm %s1976_s4, 256 }
  0x2b   : > { %p1416_p1 = scmp.ne.s32.totalorder %s1976_s4, %s1415_s19  ;;  %p1422_p10 = scmp.lt.u32.totalorder %s1415_s19, %s1976_s4 }
  0x2d   : > { %p1418_p4 = pnand %p1416_p1, %p1389_p13 }
  0x2f   : > { %p1419_p6 = pneg %p1418_p4 }
  0x31   : > { %p1424_p3 = pnand %p1422_p10, %p1419_p6 }
  0x33   : > { %1427 = shalt.err (!%p1424_p3)
}
  0x34   : > { %s1428_s11 = scalar_lea.vmem %s1685_s14, 256  ;;  %p1436_p12 = scmp.lt.s32.totalorder %s1685_s14, %s1685_s14 }
  0x35   : > { %p1429_p5 = scmp.ne.s32.totalorder %s1685_s14, %s1428_s11  ;;  %p1437_p0 = scmp.lt.s32.totalorder %s1428_s11, %s1428_s11 }
  0x37   : > { %p1431_p7 = pnand %p1429_p5, %p1389_p13  ;;  %p1438_p1 = por %p1437_p0, %p1436_p12 }
  0x39   : > { %p1432_p9 = pneg %p1431_p7 }
  0x3b   : > { %p1439_p4 = pnand %p1438_p1, %p1432_p9 }
  0x3d   : > { %1442 = shalt.err (!%p1439_p4)
}
  0x3e   : > { %1279 = dma.hbm_to_vmem [thread:$0]  (!%p1681_p11), %s1976_s4, 256, %s1685_s14, [#allocation10], %s1563_s10, %s1563_s10, %s1564_s13  }
  0x3f   : > { %s35_s16 = sadd.s32 1, %s1555_s25  ;;  %s42_s17 = sadd.s32 1, %s1547_s23 }
  0x40   : > { %p37_p13 = scmp.ge.s32.totalorder %s35_s16, 2  ;;  %p49_p6 = scmp.ne.s32.totalorder %s1547_s23, %s1543_s22 }
  0x41   : > { %p50_p10 = scmp.eq.s32.totalorder %s1559_s26, 0  ;;  %p1290_p3 = scmp.lt.s32.totalorder %s1559_s26, 2 }
  0x42   : > { %s2005_s16 = smov (%p37_p13, %s35_s16), 0  ;;  %p1749_p7 = por %p1654_p2, %p49_p6 }
  0x43   : > { %p51_p5 = por %p50_p10, %p49_p6  ;;  %s39_s18 = ssub.s32 %s1555_s25, %s2005_s16 }
  0x44   : > { %s1991_s12 = scalar_select %p1749_p7, 1, 0 }
  0x45   : > { %s249_s19 = sand.u32 1, %s1547_s23   ;;  %p40_p9 = scmp.eq.s32.totalorder %s39_s18, 0 }
  0x46   : > { %s1141_s14 = sshll.u32 %s249_s19, 2  ;;  %s1142_s10 = sshll.u32 %s1555_s25, 6 }
  0x47   : > { %s1758_s13 = scalar_select %p40_p9, %s1547_s23, %s42_s17  }
  0x48   : > { %s1763_s28 = scalar_lea.hbm %s1972_s0, %s1142_s10  ;;  %s253_s30 = scalar_lea.vmem [#allocation6], %s1141_s14 }
  0x49   : > { %s260_s11 = sshll.u32 %s253_s30, 4  ;;  %p1767_p2 = pnand %p1290_p3, %p51_p5  ;;  %s1771_s11 = int_to_ptr.vmem [resolvable:$true] %s260_s11 }
  0x4a   : > { %s250_s15 = scalar_lea.sflag [#allocation7], %s249_s19  ;;  %s1443_s17 = scalar_lea.hbm %s1763_s28, 64 }
  0x4b   : > { %p1444_p11 = scmp.ne.s32.totalorder %s1763_s28, %s1443_s17  ;;  %p1445_p12 = pneg %p1767_p2 }
  0x4c   : > { %s1448_s10 = scalar_lea.hbm %s1972_s0, 128  ;;  %p1449_p4 = scmp.lt.u32.totalorder %s1763_s28, %s1972_s0 }
  0x4d   : > { %p1446_p0 = pnand %p1445_p12, %p1444_p11  ;;  %p1450_p13 = scmp.lt.u32.totalorder %s1448_s10, %s1443_s17 }
  0x4e   : > { %p1452_p10 = scmp.lt.u32.totalorder %s1443_s17, %s1763_s28 }
  0x4f   : > { %p1447_p1 = pneg %p1446_p0  ;;  %p1451_p6 = por %p1450_p13, %p1449_p4 }
  0x51   : > { %p1453_p3 = por %p1452_p10, %p1451_p6 }
  0x53   : > { %p1454_p5 = pnand %p1453_p3, %p1447_p1 }
  0x55   : > { %1457 = shalt.err (!%p1454_p5)
}
  0x56   : > { %s1458_s19 = scalar_lea.vmem %s1771_s11, 64  ;;  %s1565_s30 = smov [#allocation6]  }
  0x57   : > { %p1459_p9 = scmp.ne.s32.totalorder %s1771_s11, %s1458_s19  ;;  %s1463_s18 = sshll.u32 %s1565_s30, 4  ;;  %s1464_s18 = int_to_ptr.vmem [resolvable:$false] %s1463_s18 }
  0x58   : > { %s1465_s14 = scalar_lea.vmem %s1464_s18, 128  ;;  %p1466_p7 = scmp.lt.s32.totalorder %s1771_s11, %s1464_s18 }
  0x59   : > { %p1461_p11 = pnand %p1459_p9, %p1445_p12  ;;  %p1467_p4 = scmp.lt.s32.totalorder %s1465_s14, %s1458_s19 }
  0x5b   : > { %p1462_p0 = pneg %p1461_p11  ;;  %p1468_p13 = por %p1467_p4, %p1466_p7 }
  0x5d   : > { %p1469_p6 = pnand %p1468_p13, %p1462_p0 }
  0x5f   : > { %1472 = shalt.err (!%p1469_p6)
}
  0x60   : > { %1283 = dma.hbm_to_vmem [thread:$0]  (!%p1767_p2), %s1763_s28, 64, %s1771_s11, %s250_s15  }
  0x61   : > { %275 = sbr.rel (%p1670_p8) target bundleno = 1713 (0x6b1), region = 44  ;;  %s1801_s17 = sand.u32 (!%p1670_p8), 1, %s1543_s22  }
  0x62   : > { %s1144_s10 = sshll.u32 (!%p1670_p8), %s1801_s17, 2  ;;  %s278_s20 = scalar_lea.sflag (!%p1670_p8), [#allocation7], %s1801_s17 }
  0x63   : > { %s281_s27 = scalar_lea.vmem (!%p1670_p8), [#allocation6], %s1144_s10  ;;  %p1993_p7 = scmp.ne.s32.totalorder (!%p1670_p8), %s1986_s7, 0 }
  0x68   : > { %1526 = dma.done.wait (%p1993_p7), %s278_s20, 64  }
  0x69   : > { %1528 = vsyncadd (%p1993_p7), %s278_s20, 4294967232  ;;  %p1994_p12 = scmp.ne.s32.totalorder %s1984_s29, 0 }
  0x6b   : > { %1530 = dma.done.wait (%p1994_p12), [#allocation10], 448  }
  0x6c   : > { %1532 = vsyncadd (%p1994_p12), [#allocation10], 4294966848  ;;  %v1566_v0 = vmov 0.0   ;;  %vm1567_vm0 = vmmov 0   ;;  %v1568_v1 = vmov 16   ;;  %v1569_v2 = vmov 0  }
  0x6d   : > { %1197 = vmatprep.subr.bf16.mxu0 %v1566_v0  ;;  %1201 = vmatprep.mubr.msk.bf16.mxu0 %vm1567_vm0, %v1566_v0  ;;  %vm360_vm1 = vcmask 1040384   ;;  %v1363_v3 = vld [vmem:[#allocation9] sm:$0xff]   ;;  %v1364_v5 = vld [vmem:[#allocation9 + $0x8] ss:$0 sps:$4 sm:$0x11]   ;;  %vm356_vm2 = vcmask 138240  }
  0x6e   : > { %1360 = vset.pattern.permute.xlu0 %v1568_v1  ;;  %1205 = vmatprep.subr.bf16.mxu1 %v1566_v0  ;;  %v362_v4 = vsel %vm360_vm1, 65535, %v1569_v2  ;;  %v329_v6 = vld [vmem:[%s281_s27] sm:$0xf]  ;;  %vm411_vm3 = vcmask 261120   ;;  %s1570_s9 = smov 96   ;;  %vm420_vm4 = vcmask 519168  }
  0x6f   : > { %1207 = vmatprep.mubr.msk.bf16.mxu1 %vm1567_vm0, %v1566_v0  ;;  %1361 = vset.pattern.permute.xlu1 %v1569_v2  ;;  %v364_v7 = vand.u32 %v1364_v5, %v362_v4  ;;  %v330_v8 = vunpack.c.l.bf16 %v329_v6  ;;  %v1148_v9 = vld [vmem:[%s1975_s3] ss:$0 sm:$0xff]  ;;  %vm443_vm5 = vcmask 64512   ;;  %s1571_s28 = smov 112   ;;  %s1572_s11 = smov 120   ;;  %vm335_vm6 = vcmask 7168  }
  0x70   : > { %1198 = vmatpush3.bf16.msra.mxu0 %v1363_v3  ;;  %s1573_s8 = smov 104   ;;  %p321_p8 = scmp.lt.s32.totalorder %s1551_s24, 1  ;;  %vm514_vm8 = vcmask 1043456   ;;  %vm684_vm12 = vcmask 130112   ;;  %vm809_vm13 = vcmask 195712   ;;  %vm934_vm14 = vcmask 261312  }
  0x71   : > { %1199 = vmatprep.subr.bf16.mxu0 %v1566_v0  ;;  %407 = vperm.xlu0 %1360, %v330_v8   ;;  %s1574_s14 = smov 88   ;;  %s1575_s10 = smov 80  }
  0x72   : > { %s322_s15 = scalar_select %p321_p8, %s1551_s24, 1 }
  0x73   : > { %s1576_s20 = smov 72   ;;  %s1577_s27 = smov 8  }
  0x74   : > { %1200 = vmatpush3.bf16.msra.mxu0 %v364_v7  ;;  %s323_s18 = scalar_lea.vmem %s1973_s1, %s322_s15  ;;  %s1578_s29 = smov 16  }
  0x75   : > { %1211 = vmatprep.subr.bf16.mxu0 %v1566_v0  ;;  %1362 = vset.pattern.permute.xlu0 %v1569_v2  ;;  %v1153_v61 = vld [vmem:[%s323_s18] ss:$0 sm:$0xff]  ;;  %s1579_s7 = smov 24   ;;  %p1995_p1 = scmp.ne.s32.totalorder %s1991_s12, 0 }
  0x77   : > { %1202 = vmatmul.mubr.msk.bf16.vlgmr.msra.gmra.mrb[0].mxu0 %vm356_vm2, %v329_v6 }
  0x78   : > { %1213 = vmatprep.mubr.msk.bf16.mxu0 %vm1567_vm0, %v1566_v0 }
  0xf0   : > { %v408_v11 = vpop.permute.xlu0 %407 }
 0x14a   : > { %v400_v10 = vpop.f32.mrb[0].mxu0 }
 0x14b   : > { %v401_v12 = vadd.f32 %v1148_v9, %v400_v10  ;;  %v1203_v13 = vpop.f32.mrb[1].mxu0 }
 0x14c   : > { %v403_v14 = vpop.f32.mrb[2].mxu0 }
 0x14d   : > { %v410_v15 = vmul.f32 %v408_v11, %v401_v12  ;;  %v1204_v16 = vpop.f32.mrb[3].mxu0 }
 0x14f   : > { %412 = vst.msk [vmem:[#allocation2] sm:$0xff] %vm411_vm3, %v410_v15  ;;  %v1174_v17 = vpack.c.bf16 %v410_v15, %v410_v15 }
 0x151   : > { %417 = vrot.lane.b32.xlu0 %v1174_v17, %s1570_s9 }
 0x156   : > { %v1828_v19 = vld [vmem:[#allocation2] sm:$0xff] }
 0x157   : > { %v440_v20 = vmul.f32 0.17677669, %v1828_v19 }
 0x159   : > { %v441_v26 = vpack.c.bf16 %v440_v20, %v440_v20 }
 0x1c3   : > { %v418_v18 = vpop.permute.xlu0 %417 }
 0x1c4   : > { %421 = vst.msk [vmem:[#allocation3] sm:$0xf] %vm420_vm4, %v418_v18 }
 0x1cb   : > { %v1831_v21 = vld [vmem:[#allocation3] sm:$0xf] }
 0x1cc   : > { %v1833_v22 = vld [vmem:[#allocation3] ss:$0 sps:$4 sm:$0xff]   ;;  %v448_v23 = vsel %vm443_vm5, %v1831_v21, 0 }
 0x1cd   : > { %v1837_v24 = vld [vmem:[#allocation3] ss:$0 sps:$4 sm:$0xff]   ;;  %1206 = vmatpush3.bf16.xpose.msra.mxu1 %v448_v23  ;;  %692 = vrot.lane.b32.xlu0 %v1833_v22, %s1571_s28 }
 0x1ce   : > { %567 = vrot.lane.b32.xlu1 %v1837_v24, %s1572_s11  ;;  %1217 = vmatprep.subr.bf16.mxu1 %v1566_v0  ;;  %v1842_v25 = vld [vmem:[#allocation3] ss:$0 sps:$4 sm:$0xff]  }
 0x1d1   : > { %817 = vrot.lane.b32.xlu0 %v1842_v25, %s1573_s8 }
 0x1d2   : > { %562 = vrot.lane.b32.xlu1 %v441_v26, %s1572_s11  ;;  %s1147_s11 = sshll.u32 %s1801_s17, 3 }
 0x1d3   : > { %s320_s15 = scalar_lea.vmem [#allocation12], %s1147_s11 }
 0x1d4   : > { %1208 = vmatmul.mubr.msk.bf16.vlgmr.msra.gmra.mrb[0].mxu1 %vm443_vm5, %v441_v26  ;;  %s1024_s19 = sshll.u32 %s320_s15, 4  ;;  %s1924_s19 = int_to_ptr.vmem [resolvable:$true] %s1024_s19 }
 0x1d5   : > { %1219 = vmatprep.mubr.msk.bf16.mxu1 %vm1567_vm0, %v1566_v0  ;;  %332 = vrot.lane.b32.xlu0 %v330_v8, %s1571_s28 }
 0x1d6   : > { %687 = vrot.lane.b32.xlu1 %v441_v26, %s1571_s28 }
 0x1da   : > { %812 = vrot.lane.b32.xlu1 %v441_v26, %s1573_s8  ;;  %s1171_s8 = sshll.u32 %s1551_s24, 7  ;;  %s1580_s24 = smov [#allocation12]  }
 0x23f   : > { %v693_v27 = vpop.permute.xlu0 %692 }
 0x240   : > { %v568_v28 = vpop.permute.xlu1 %567  ;;  %v698_v33 = vsel %vm443_vm5, %v693_v27, 0  ;;  %v1155_v27 = vcombine.low %v1831_v21, %v1831_v21 }
 0x241   : > { %v573_v29 = vsel %vm443_vm5, %v568_v28, 0 }
 0x242   : > { %1218 = vmatpush3.bf16.xpose.msra.mxu1 %v573_v29 }
 0x243   : > { %v818_v30 = vpop.permute.xlu0 %817  ;;  %1229 = vmatprep.subr.bf16.mxu1 %v1566_v0 }
 0x244   : > { %v563_v32 = vpop.permute.xlu1 %562  ;;  %v823_v35 = vsel %vm443_vm5, %v818_v30, 0 }
 0x247   : > { %v333_v31 = vpop.permute.xlu0 %332 }
 0x248   : > { %336 = vst.msk [vmem:[#allocation4] sm:$0xff] %vm335_vm6, %v333_v31  ;;  %v688_v34 = vpop.permute.xlu1 %687 }
 0x249   : > { %1220 = vmatmul.mubr.msk.bf16.vlgmr.msra.gmra.mrb[4].mxu1 %vm443_vm5, %v563_v32 }
 0x24a   : > { %1230 = vmatpush3.bf16.xpose.msra.mxu1 %v698_v33  ;;  %1231 = vmatprep.mubr.msk.bf16.mxu1 %vm1567_vm0, %v1566_v0 }
 0x24b   : > { %1241 = vmatprep.subr.bf16.mxu1 %v1566_v0 }
 0x24c   : > { %v813_v36 = vpop.permute.xlu1 %812 }
 0x24f   : > { %v426_v42 = vld [vmem:[#allocation4] sm:$0xff] }
 0x251   : > { %1232 = vmatmul.mubr.msk.bf16.vlgmr.msra.gmra.mrb[8].mxu1 %vm443_vm5, %v688_v34 }
 0x252   : > { %1242 = vmatpush3.bf16.xpose.msra.mxu1 %v823_v35  ;;  %1243 = vmatprep.mubr.msk.bf16.mxu1 %vm1567_vm0, %v1566_v0 }
 0x253   : > { %1253 = vmatprep.subr.bf16.mxu1 %v1566_v0 }
 0x259   : > { %1244 = vmatmul.mubr.msk.bf16.vlgmr.msra.gmra.mrb[12].mxu1 %vm443_vm5, %v813_v36 }
 0x25a   : > { %1257 = vmatprep.mubr.msk.bf16.mxu1 %vm1567_vm0, %v1566_v0 }
 0x2a7   : > { %v484_v37 = vpop.f32.mrb[0].mxu1 }
 0x2a8   : > { %v1209_v38 = vpop.f32.mrb[1].mxu1  ;;  %v490_v39 = vsel %vm443_vm5, %v484_v37, -inf }
 0x2a9   : > { %491 = vmax.xlane.f32.xlu1 %v490_v39  ;;  %v487_v40 = vpop.f32.mrb[2].mxu1 }
 0x2aa   : > { %v1210_v41 = vpop.f32.mrb[3].mxu1 }
 0x2ba   : > { %430 = vperm.xlu1 %1361, %v426_v42  }
 0x31c   : > { %v609_v43 = vpop.f32.mrb[4].mxu1 }
 0x31d   : > { %v1221_v44 = vpop.f32.mrb[5].mxu1  ;;  %v615_v45 = vsel %vm443_vm5, %v609_v43, -inf }
 0x31e   : > { %616 = vmax.xlane.f32.xlu0 %v615_v45  ;;  %v612_v46 = vpop.f32.mrb[6].mxu1 }
 0x31f   : > { %v1222_v47 = vpop.f32.mrb[7].mxu1 }
 0x324   : > { %v734_v48 = vpop.f32.mrb[8].mxu1 }
 0x325   : > { %v1233_v49 = vpop.f32.mrb[9].mxu1  ;;  %v740_v50 = vsel %vm443_vm5, %v734_v48, -inf }
 0x326   : > { %741 = vmax.xlane.f32.xlu0 %v740_v50  ;;  %v737_v51 = vpop.f32.mrb[10].mxu1 }
 0x327   : > { %v1234_v52 = vpop.f32.mrb[11].mxu1 }
 0x32c   : > { %v859_v53 = vpop.f32.mrb[12].mxu1 }
 0x32d   : > { %v1245_v54 = vpop.f32.mrb[13].mxu1  ;;  %v865_v55 = vsel %vm443_vm5, %v859_v53, -inf }
 0x32e   : > { %866 = vmax.xlane.f32.xlu0 %v865_v55  ;;  %v862_v56 = vpop.f32.mrb[14].mxu1 }
 0x32f   : > { %v1246_v57 = vpop.f32.mrb[15].mxu1 }
 0x336   : > { %v492_v58 = vpop.xlane.xlu1 %491 }
 0x337   : > { %v493_v59 = vsub.f32 %v484_v37, %v492_v58 }
 0x339   : > { %v494_v60 = vmul.f32 1.442695, %v493_v59 }
 0x33a   : > { %v1872_v62 = vpop.permute.xlu1 %430 }
 0x33b   : > { %1371 = vpow2.f32 %v494_v60  ;;  %v439_v63 = vmul.f32 %v1153_v61, %v1872_v62 }
 0x345   : > { %v1372_v1 = vpop.eup %1371 }
 0x346   : > { %v496_v2 = vmul.f32 %v1372_v1, %v439_v63 }
 0x348   : > { %v497_v3 = vsel %vm443_vm5, %v496_v2, 0.0 }
 0x349   : > { %498 = vadd.xlane.f32.xlu0 %v497_v3  ;;  %v1369_v3 = vld [vmem:[#allocation11] sm:$0xff]  }
 0x34a   : > { %1254 = vmatpush3.bf16.msra.mxu1 %v1369_v3 }
 0x34b   : > { %1255 = vmatprep.subr.bf16.mxu1 %v1566_v0 }
 0x3ab   : > { %v617_v4 = vpop.xlane.xlu0 %616 }
 0x3ac   : > { %v618_v5 = vsub.f32 %v609_v43, %v617_v4 }
 0x3ae   : > { %v619_v6 = vmul.f32 1.442695, %v618_v5  ;;  %v1370_v5 = vld [vmem:[#allocation11 + $0x8] sm:$0xff]  }
 0x3af   : > { %1256 = vmatpush3.bf16.msra.mxu1 %v1370_v5 }
 0x3b0   : > { %1373 = vpow2.f32 %v619_v6 }
 0x3b3   : > { %v742_v7 = vpop.xlane.xlu0 %741 }
 0x3b4   : > { %v743_v8 = vsub.f32 %v734_v48, %v742_v7 }
 0x3b6   : > { %v744_v9 = vmul.f32 1.442695, %v743_v8 }
 0x3b8   : > { %1375 = vpow2.f32 %v744_v9 }
 0x3ba   : > { %v1374_v10 = vpop.eup %1373 }
 0x3bb   : > { %v867_v11 = vpop.xlane.xlu0 %866  ;;  %v621_v12 = vmul.f32 %v1374_v10, %v439_v63 }
 0x3bc   : > { %v868_v13 = vsub.f32 %v859_v53, %v867_v11 }
 0x3bd   : > { %v622_v14 = vsel %vm443_vm5, %v621_v12, 0.0 }
 0x3be   : > { %v869_v15 = vmul.f32 1.442695, %v868_v13  ;;  %623 = vadd.xlane.f32.xlu0 %v622_v14 }
 0x3c0   : > { %1377 = vpow2.f32 %v869_v15 }
 0x3c2   : > { %v1376_v16 = vpop.eup %1375 }
 0x3c3   : > { %v746_v17 = vmul.f32 %v1376_v16, %v439_v63 }
 0x3c5   : > { %v747_v18 = vsel %vm443_vm5, %v746_v17, 0.0 }
 0x3c6   : > { %748 = vadd.xlane.f32.xlu0 %v747_v18 }
 0x3ca   : > { %v1378_v20 = vpop.eup %1377 }
 0x3cb   : > { %v1878_v23 = vmul.f32 %v1378_v20, %v439_v63 }
 0x3cd   : > { %v872_v26 = vsel %vm443_vm5, %v1878_v23, 0.0 }
 0x3ce   : > { %873 = vadd.xlane.f32.xlu1 %v872_v26 }
 0x3d6   : > { %v499_v28 = vpop.xlane.xlu0 %498 }
 0x3d7   : > { %v501_v29 = vadd.f32 1e-16, %v499_v28  ;;  %vm500_vm7 = vcmp.gt.f32.partialorder %v499_v28, 0.0 }
 0x3d9   : > { %1379 = vrcp.f32 %v501_v29 }
 0x3dc   : > { %509 = vrot.lane.b32.xlu0 %v1155_v27, %s1570_s9 }
 0x3e0   : > { %631 = vrot.lane.b32.xlu0 %v1837_v24, %s1574_s14  ;;  %s1922_s14 = scalar_lea.hbm %s1978_s6, %s1171_s8 }
 0x3e3   : > { %v1380_v32 = vpop.eup %1379 }
 0x3e4   : > { %756 = vrot.lane.b32.xlu0 %v1833_v22, %s1575_s10  ;;  %v503_v21 = vsel %vm500_vm7, %v1380_v32, 0.0  ;;  %s1010_s10 = scalar_lea.sflag [#allocation8], %s1801_s17 }
 0x3e5   : > { %v504_v35 = vmul.f32 %v503_v21, %v496_v2 }
 0x3e8   : > { %881 = vrot.lane.b32.xlu0 %v1842_v25, %s1576_s20  ;;  %v505_v25 = vpack.c.bf16 %v504_v35, %v504_v35  ;;  %s1473_s20 = scalar_lea.vmem %s1924_s19, 128 }
 0x3e9   : > { %p1474_p2 = scmp.ne.s32.totalorder %s1924_s19, %s1473_s20 }
 0x3eb   : > { %p1475_p10 = pnand %p1474_p2, %p1995_p1 }
 0x3ed   : > { %p1476_p3 = pneg %p1475_p10 }
 0x44b   : > { %v624_v30 = vpop.xlane.xlu0 %623 }
 0x44c   : > { %v626_v31 = vadd.f32 1e-16, %v624_v30  ;;  %vm625_vm9 = vcmp.gt.f32.partialorder %v624_v30, 0.0 }
 0x44e   : > { %1381 = vrcp.f32 %v626_v31 }
 0x453   : > { %v749_v33 = vpop.xlane.xlu0 %748 }
 0x454   : > { %v751_v34 = vadd.f32 1e-16, %v749_v33  ;;  %vm750_vm10 = vcmp.gt.f32.partialorder %v749_v33, 0.0 }
 0x456   : > { %1383 = vrcp.f32 %v751_v34 }
 0x457   : > { %v510_v24 = vpop.permute.xlu0 %509 }
 0x458   : > { %v1382_v36 = vpop.eup %1381  ;;  %v516_v22 = vsel %vm514_vm8, %v510_v24, 0 }
 0x459   : > { %1212 = vmatpush3.bf16.msra.mxu0 %v516_v22  ;;  %v628_v37 = vsel %vm625_vm9, %v1382_v36, 0.0 }
 0x45a   : > { %1223 = vmatprep.subr.bf16.mxu0 %v1566_v0  ;;  %v629_v42 = vmul.f32 %v628_v37, %v621_v12 }
 0x45b   : > { %v874_v38 = vpop.xlane.xlu1 %873  ;;  %v632_v39 = vpop.permute.xlu0 %631 }
 0x45c   : > { %v876_v40 = vadd.f32 1e-16, %v874_v38  ;;  %v637_v41 = vsel %vm514_vm8, %v632_v39, 0  ;;  %1214 = vmatmul.mubr.msk.bf16.vlgmr.msra.gmra.mrb[4].mxu0 %vm443_vm5, %v505_v25  ;;  %v630_v45 = vpack.c.bf16 %v629_v42, %v629_v42  ;;  %vm875_vm11 = vcmp.gt.f32.partialorder %v874_v38, 0.0 }
 0x45d   : > { %1224 = vmatpush3.bf16.msra.mxu0 %v637_v41  ;;  %1225 = vmatprep.mubr.msk.bf16.mxu0 %vm1567_vm0, %v1566_v0 }
 0x45e   : > { %1385 = vrcp.f32 %v876_v40  ;;  %1235 = vmatprep.subr.bf16.mxu0 %v1566_v0 }
 0x45f   : > { %v757_v44 = vpop.permute.xlu0 %756 }
 0x460   : > { %v1384_v43 = vpop.eup %1383  ;;  %v762_v47 = vsel %vm514_vm8, %v757_v44, 0 }
 0x461   : > { %v753_v46 = vsel %vm750_vm10, %v1384_v43, 0.0 }
 0x462   : > { %v754_v48 = vmul.f32 %v753_v46, %v746_v17 }
 0x463   : > { %v882_v50 = vpop.permute.xlu0 %881 }
 0x464   : > { %1226 = vmatmul.mubr.msk.bf16.vlgmr.msra.gmra.mrb[8].mxu0 %vm443_vm5, %v630_v45  ;;  %v755_v51 = vpack.c.bf16 %v754_v48, %v754_v48  ;;  %v887_v53 = vsel %vm514_vm8, %v882_v50, 0 }
 0x465   : > { %1236 = vmatpush3.bf16.msra.mxu0 %v762_v47  ;;  %1237 = vmatprep.mubr.msk.bf16.mxu0 %vm1567_vm0, %v1566_v0 }
 0x466   : > { %1247 = vmatprep.subr.bf16.mxu0 %v1566_v0 }
 0x468   : > { %v1386_v49 = vpop.eup %1385 }
 0x469   : > { %v878_v52 = vsel %vm875_vm11, %v1386_v49, 0.0 }
 0x46a   : > { %v879_v54 = vmul.f32 %v878_v52, %v1878_v23  ;;  %v1166_v23 = vld [vmem:[%s1977_s5] ss:$0 sm:$0xff] }
 0x46c   : > { %1238 = vmatmul.mubr.msk.bf16.vlgmr.msra.gmra.mrb[12].mxu0 %vm443_vm5, %v755_v51  ;;  %v880_v55 = vpack.c.bf16 %v879_v54, %v879_v54 }
 0x46d   : > { %1248 = vmatpush3.bf16.msra.mxu0 %v887_v53  ;;  %1249 = vmatprep.mubr.msk.bf16.mxu0 %vm1567_vm0, %v1566_v0 }
 0x474   : > { %1250 = vmatmul.mubr.msk.bf16.vlgmr.msra.gmra.mrb[16].mxu0 %vm443_vm5, %v880_v55 }
 0x52f   : > { %v552_v56 = vpop.f32.mrb[4].mxu0 }
 0x530   : > { %v558_v57 = vadd.f32 %v552_v56, %v1828_v19  ;;  %v1215_v58 = vpop.f32.mrb[5].mxu0 }
 0x531   : > { %v555_v59 = vpop.f32.mrb[6].mxu0 }
 0x532   : > { %559 = vst.msk [vmem:[#allocation5] sm:$0xff] %vm443_vm5, %v558_v57  ;;  %v1216_v60 = vpop.f32.mrb[7].mxu0 }
 0x537   : > { %v673_v61 = vpop.f32.mrb[8].mxu0 }
 0x538   : > { %680 = vrot.lane.b32.xlu0 %v673_v61, %s1577_s27  ;;  %v1227_v63 = vpop.f32.mrb[9].mxu0  ;;  %s1477_s27 = sshll.u32 %s1580_s24, 4  ;;  %s1478_s27 = int_to_ptr.vmem [resolvable:$false] %s1477_s27 }
 0x539   : > { %v676_v1 = vpop.f32.mrb[10].mxu0  ;;  %p1480_p5 = scmp.lt.s32.totalorder %s1924_s19, %s1478_s27 }
 0x53a   : > { %v1228_v2 = vpop.f32.mrb[11].mxu0 }
 0x53f   : > { %v798_v4 = vpop.f32.mrb[12].mxu0 }
 0x540   : > { %805 = vrot.lane.b32.xlu1 %v798_v4, %s1578_s29  ;;  %v1239_v6 = vpop.f32.mrb[13].mxu0  ;;  %s1479_s29 = scalar_lea.vmem %s1478_s27, 256 }
 0x541   : > { %v801_v7 = vpop.f32.mrb[14].mxu0  ;;  %p1481_p9 = scmp.lt.s32.totalorder %s1479_s29, %s1473_s20 }
 0x542   : > { %v1240_v8 = vpop.f32.mrb[15].mxu0 }
 0x543   : > { %p1482_p11 = por %p1481_p9, %p1480_p5 }
 0x545   : > { %p1483_p0 = pnand %p1482_p11, %p1476_p3 }
 0x547   : > { %v923_v9 = vpop.f32.mrb[16].mxu0 }
 0x548   : > { %930 = vrot.lane.b32.xlu0 %v923_v9, %s1579_s7  ;;  %v1251_v10 = vpop.f32.mrb[17].mxu0 }
 0x549   : > { %v926_v11 = vpop.f32.mrb[18].mxu0 }
 0x54a   : > { %v1252_v12 = vpop.f32.mrb[19].mxu0 }
 0x5aa   : > { %v681_v13 = vpop.permute.xlu0 %680 }
 0x5ab   : > { %v683_v14 = vadd.f32 %v681_v13, %v1828_v19 }
 0x5ad   : > { %685 = vst.msk [vmem:[#allocation5] sm:$0xff] %vm684_vm12, %v683_v14 }
 0x5b2   : > { %v806_v15 = vpop.permute.xlu1 %805 }
 0x5b3   : > { %v808_v16 = vadd.f32 %v806_v15, %v1828_v19 }
 0x5b5   : > { %810 = vst.msk [vmem:[#allocation5] sm:$0xff] %vm809_vm13, %v808_v16 }
 0x5ba   : > { %v931_v0 = vpop.permute.xlu0 %930 }
 0x5bb   : > { %v933_v17 = vadd.f32 %v931_v0, %v1828_v19 }
 0x5bd   : > { %935 = vst.msk [vmem:[#allocation5] sm:$0xff] %vm934_vm14, %v933_v17 }
 0x5c4   : > { %v936_v18 = vld [vmem:[#allocation5] sm:$0xff] }
 0x5c5   : > { %v937_v20 = vpack.c.bf16 %v936_v18, %v936_v18 }
 0x5c7   : > { %1258 = vmatmul.mubr.msk.bf16.vlgmr.msra.gmra.mrb[16].mxu1 %vm411_vm3, %v937_v20 }
 0x69a   : > { %v999_v26 = vpop.f32.mrb[16].mxu1 }
 0x69b   : > { %v1000_v27 = vadd.f32 %v1166_v23, %v999_v26  ;;  %v1259_v28 = vpop.f32.mrb[17].mxu1 }
 0x69c   : > { %v1002_v29 = vpop.f32.mrb[18].mxu1 }
 0x69d   : > { %v1005_v30 = vmul.f32 %v1000_v27, %v1872_v62  ;;  %v1260_v31 = vpop.f32.mrb[19].mxu1 }
 0x69f   : > { %v1006_v19 = vmax.f32 %v1005_v30, 0.0 }
 0x6a1   : > { %v1007_v32 = vadd.f32 %v1006_v19, %v936_v18 }
 0x6a3   : > { %1008 = vst.msk [vmem:[%s320_s15] sm:$0xff] %vm411_vm3, %v1007_v32 }
 0x6a4   : > { %1486 = shalt.err (!%p1483_p0)
}
 0x6a5   : > { %s1487_s17 = scalar_lea.hbm %s1922_s14, 128  ;;  %s1491_s28 = scalar_lea.hbm %s1978_s6, 256 }
 0x6a6   : > { %p1488_p4 = scmp.ne.s32.totalorder %s1922_s14, %s1487_s17  ;;  %p1492_p7 = scmp.lt.u32.totalorder %s1922_s14, %s1978_s6 }
 0x6a7   : > { %p1493_p12 = scmp.lt.u32.totalorder %s1491_s28, %s1487_s17  ;;  %p1495_p2 = scmp.lt.u32.totalorder %s1487_s17, %s1922_s14 }
 0x6a8   : > { %p1489_p13 = pnand %p1488_p4, %p1995_p1 }
 0x6a9   : > { %p1494_p8 = por %p1493_p12, %p1492_p7 }
 0x6aa   : > { %p1490_p6 = pneg %p1489_p13 }
 0x6ab   : > { %p1496_p10 = por %p1495_p2, %p1494_p8 }
 0x6ad   : > { %p1497_p3 = pnand %p1496_p10, %p1490_p6 }
 0x6af   : > { %1500 = shalt.err (!%p1497_p3)
}
 0x6b0   : > { %1271 = dma.vmem_to_hbm [thread:$0]  (%p1995_p1), %s1924_s19, 128, %s1922_s14, %s1010_s10  }
 0x6b1 PF: > { %s1996_s15 = sld [smem:[#allocation16_spill]]  ;;  %s1036_s30 = sand.u32 1, %s1539_s21  }
 0x6b2   : > { %p1998_p9 = scmp.ge.s32.totalorder %s1559_s26, 2  ;;  %s1037_s18 = scalar_lea.sflag [#allocation8], %s1036_s30 }
 0x6b7   : > { %p1997_p5 = scmp.ne.s32.totalorder %s1996_s15, 0 }
 0x6b9   : > { %p1285_p11 = pnand %p1998_p9, %p1997_p5 }
 0x6bb   : > { %1534 = dma.done.wait (!%p1285_p11), %s1037_s18, 128  }
 0x6bc   : > { %1536 = vsyncadd (!%p1285_p11), %s1037_s18, 4294967168  ;;  %s23_s26 = sadd.s32 1, %s1559_s26   ;;  %s1999_s21 = smov %s1543_s22 }
 0x6bd   : > { %p20_p0 = scmp.ge.s32.totalorder %s23_s26, 4   ;;  %s2000_s22 = smov %s1547_s23 }
 0x6be   : > { %s2001_s23 = smov %s1758_s13  ;;  %s2002_s24 = smov %s1555_s25 }
 0x6bf   : > { %s2003_s25 = smov %s2005_s16  ;;  %22 = sbr.rel (!%p20_p0) target bundleno = 7 (0x7), region = 106 }
 0x6c6   :  { %1042 = vsyncpa [#allocation7], 1 }
 0x6c7   :  { %1044 = vsyncpa [#allocation7 + $0x1], 1 }
 0x6c8   :  { %1045 = vsyncpa [#allocation10], 1 }
 0x6c9   :  { %1046 = vsyncpa [#allocation8], 1 }
 0x6ca   :  { %1048 = vsyncpa [#allocation8 + $0x1], 1 }

</bundles_post_ra>
